<compile_context>
chip_gen: v6e
topology: v6e:2x2x1
jax: 0.10.0
libtpu: 0.0.40
codegen_flags: <defaults>
</compile_context>

<pallas_src>
import jax
import jax.numpy as jnp
from jax.experimental import pallas as pl
from jax.experimental.pallas import tpu as pltpu

LANE = 128              # vreg lane width
TM_MAX_DEFAULT = 4096   # rows per grid step (2 MiB f32 per input per buffer)
TM_MAX_V6E = 8192       # v6e: bigger scoped-VMEM default, amortize further
CHUNK = 256             # rows per inner accumulation chunk (128 KiB f32)


def _round_up(x, m):
    return (x + m - 1) // m * m


def _device_kind():
    try:
        return (getattr(jax.devices()[0], "device_kind", "") or "").lower()
    except Exception:
        return ""


def _tpu_config():
    """Best-effort per-generation tuning; safe defaults if detection fails."""
    kind = _device_kind()
    tm_max = TM_MAX_DEFAULT
    num_tc = 1
    if "v6" in kind:
        tm_max = TM_MAX_V6E
    if "v7" in kind or "7x" in kind:
        num_tc = 2                                    # 2 TensorCores / chip
    elif "v4" in kind and "lite" not in kind:
        num_tc = 2                                    # v4 megacore
    elif "v5p" in kind or ("v5" in kind and "lite" not in kind
                           and "v5e" not in kind):
        num_tc = 2                                    # v5p megacore
    return kind, tm_max, num_tc


def _make_sums_kernel(tm, chunk, rows, steps_per_split, num_splits):
    """Accumulate per-(sublane, lane) partials of
    [sum(yt*yp), sum(yt), sum(yp)] into a resident (3, 8, 128) block."""
    n_chunks = tm // chunk
    first_masked = rows // tm                  # block idx where masking starts
    needs_mask = num_splits * steps_per_split > first_masked
    unroll = True if n_chunks <= 16 else 8

    def kernel(yt_ref, yp_ref, out_ref):
        c = pl.program_id(0)                   # parallel split (megacore/2-TC)
        j = pl.program_id(1)                   # sequential accumulation axis

        @pl.when(j == 0)
        def _init():
            out_ref[...] = jnp.zeros_like(out_ref)

        b = c * steps_per_split + j            # logical row-block index

        def accum_block(mask_rows):
            def body(i, carry):
                a_tp, a_t, a_p = carry
                r0 = pl.multiple_of(i * chunk, 8)
                yt = yt_ref[pl.ds(r0, chunk), :].astype(jnp.float32)
                yp = yp_ref[pl.ds(r0, chunk), :].astype(jnp.float32)
                if mask_rows:
                    # Mask BEFORE arithmetic: overhanging / idle block rows
                    # are undefined (possibly NaN/Inf) and must never enter
                    # the products or sums.
                    ridx = (jax.lax.broadcasted_iota(jnp.int32, (chunk, 1), 0)
                            + (b * tm + r0))
                    valid = ridx < rows
                    yt = jnp.where(valid, yt, 0.0)
                    yp = jnp.where(valid, yp, 0.0)
                yt3 = yt.reshape(chunk // 8, 8, LANE)   # layout-preserving
                yp3 = yp.reshape(chunk // 8, 8, LANE)
                return (a_tp + jnp.sum(yt3 * yp3, axis=0),
                        a_t + jnp.sum(yt3, axis=0),
                        a_p + jnp.sum(yp3, axis=0))

            init = (jnp.zeros((8, LANE), jnp.float32),) * 3
            try:
                a_tp, a_t, a_p = jax.lax.fori_loop(0, n_chunks, body, init,
                                                   unroll=unroll)
            except TypeError:          # older jax without fori_loop unroll=
                a_tp, a_t, a_p = jax.lax.fori_loop(0, n_chunks, body, init)
            out_ref[0] += a_tp         # sum(yt*yp) partials
            out_ref[1] += a_t          # sum(yt)     partials
            out_ref[2] += a_p          # sum(yp)     partials

        if needs_mask:
            @pl.when(b < first_masked)             # fully in-bounds block
            def _full():
                accum_block(False)

            @pl.when(b >= first_masked)            # partial / idle block slot
            def _tail():
                accum_block(True)
        else:
            accum_block(False)

    return kernel


def _tversky_sums_pallas(yt_flat, yp_flat, _tm_max=None):
    """Returns (sum(yt*yp), sum(yt), sum(yp)) as f32 scalars."""
    n = yt_flat.shape[0]
    if n % LANE != 0:
        # Rare path (flattened size not lane-aligned): zero-pad so the flat
        # array can be viewed as (rows, 128); zeros contribute nothing to any
        # of the three sums.  Aligned inputs (the common segmentation case)
        # take the copy-free reshape path below.
        pad = _round_up(n, LANE) - n
        yt_flat = jnp.pad(yt_flat, (0, pad))
        yp_flat = jnp.pad(yp_flat, (0, pad))

    rows = yt_flat.shape[0] // LANE
    yt2 = yt_flat.reshape(rows, LANE)              # free reshape, no copy
    yp2 = yp_flat.reshape(rows, LANE)

    kind, tm_max, num_tc = _tpu_config()
    if _tm_max is not None:
        tm_max = _tm_max

    # Sublane multiple required by the narrowest input dtype
    # (8 for 32-bit, 16 for 16-bit, 32 for 8-bit / bool).
    sub_mult = max(32 // jnp.dtype(yt2.dtype).itemsize,
                   32 // jnp.dtype(yp2.dtype).itemsize, 8)

    tm = min(tm_max, _round_up(rows, sub_mult))
    if tm >= CHUNK:
        chunk = CHUNK
        tm = _round_up(tm, CHUNK)     # any overhang is masked in the kernel
    else:
        chunk = tm

    total_blocks = -(-rows // tm)
    num_splits = max(1, min(num_tc, total_blocks))
    steps_per_split = -(-total_blocks // num_splits)

    def in_index(c, j):
        # Clamp idle slots in bounds; their contribution is masked to zero.
        return (jnp.minimum(c * steps_per_split + j, total_blocks - 1), 0)

    kernel = _make_sums_kernel(tm, chunk, rows, steps_per_split, num_splits)

    # Extra input buffering on v7x where per-tile DMA is short relative to
    # per-step setup; fall back silently where unsupported.
    n_buf = 2
    in_spec = pl.BlockSpec((tm, LANE), in_index)
    if ("v7" in kind or "7x" in kind) and hasattr(pl, "Buffered"):
        try:
            in_spec = pl.BlockSpec((tm, LANE), in_index,
                                   pipeline_mode=pl.Buffered(3))
            n_buf = 3
        except TypeError:
            in_spec = pl.BlockSpec((tm, LANE), in_index)

    itm_bytes = (jnp.dtype(yt2.dtype).itemsize + jnp.dtype(yp2.dtype).itemsize)
    vmem_limit = min(n_buf * tm * LANE * itm_bytes + (8 << 20), 48 << 20)

    parts = pl.pallas_call(
        kernel,
        out_shape=jax.ShapeDtypeStruct((num_splits, 3, 8, LANE), jnp.float32),
        grid_spec=pltpu.PrefetchScalarGridSpec(
            num_scalar_prefetch=0,
            grid=(num_splits, steps_per_split),
            in_specs=[in_spec, in_spec],
            # One resident (3, 8, 128) accumulator block per parallel split.
            out_specs=pl.BlockSpec((None, 3, 8, LANE), lambda c, j: (c, 0, 0, 0)),
        ),
        compiler_params=pltpu.CompilerParams(
            dimension_semantics=("parallel", "arbitrary"),
            vmem_limit_bytes=int(vmem_limit)),
    )(yt2, yp2)

    sums = jnp.sum(parts, axis=(0, 2, 3))          # (3,) -> [tp, sum_t, sum_p]
    return sums[0], sums[1], sums[2]


def focal_tversky_loss(y_pred, y_true, smooth=1.0, gamma=0.75, alpha=0.7,
                       min_pallas_elems=65536, force_pallas=False,
                       _tm_max=None):
    # Keep native dtypes through HBM; widening to f32 happens in the kernel.
    yt = jnp.ravel(y_true)
    yp = jnp.ravel(y_pred)
    n = yt.shape[0]

    if force_pallas or n >= min_pallas_elems:
        tp, sum_t, sum_p = _tversky_sums_pallas(yt, yp, _tm_max=_tm_max)
    else:
        # Tiny inputs: kernel launch overhead dominates; fused XLA wins.
        ytf = yt.astype(jnp.float32)
        ypf = yp.astype(jnp.float32)
        tp = jnp.sum(ytf * ypf)
        sum_t = jnp.sum(ytf)
        sum_p = jnp.sum(ypf)

    # fn == sum(yt*(1-yp)), fp == sum((1-yt)*yp).  Clamp at 0 so f32
    # cancellation can never push pt_1 above 1 and NaN the fractional power.
    false_neg = jnp.maximum(sum_t - tp, 0.0)
    false_pos = jnp.maximum(sum_p - tp, 0.0)

    # TODO(synk): the logger.info(...) side effect of the PyTorch forward
    # (string logging of tp/fn/fp) has no Pallas equivalent; skipped.
    pt_1 = (tp + smooth) / (
        tp + alpha * false_neg + (1.0 - alpha) * false_pos + smooth)
    return jnp.power(jnp.maximum(1.0 - pt_1, 0.0), gamma)


def _reference(y_pred, y_true, smooth=1.0, gamma=0.75, alpha=0.7):
    yt = jnp.ravel(y_true).astype(jnp.float32)
    yp = jnp.ravel(y_pred).astype(jnp.float32)
    tp = jnp.sum(yt * yp)
    fn = jnp.sum(yt * (1.0 - yp))
    fp = jnp.sum((1.0 - yt) * yp)
    pt_1 = (tp + smooth) / (tp + alpha * fn + (1.0 - alpha) * fp + smooth)
    return jnp.power(1.0 - pt_1, gamma)


if __name__ == "__main__":
    key = jax.random.PRNGKey(0)
    kp, kt, kp2, kt2 = jax.random.split(key, 4)

    # Small shape consistent with the module (NCHW segmentation pred/mask).
    y_pred = jax.nn.sigmoid(jax.random.normal(kp, (2, 4, 16, 16), jnp.float32))
    y_true = (jax.random.uniform(kt, (2, 4, 16, 16)) > 0.5).astype(jnp.float32)

    loss = focal_tversky_loss(y_pred, y_true, force_pallas=True)
    loss = jax.block_until_ready(loss)
    ref = _reference(y_pred, y_true)
    assert jnp.allclose(loss, ref, rtol=1e-4, atol=1e-6), (loss, ref)

    # Larger shape: exercises the chunked accumulation + in-kernel row-tail
    # masking path (2400 rows of 128, one overhanging 2560-row block).
    y_pred2 = jax.nn.sigmoid(jax.random.normal(kp2, (4, 3, 160, 160), jnp.float32))
    y_true2 = (jax.random.uniform(kt2, (4, 3, 160, 160)) > 0.5).astype(jnp.float32)

    loss2 = jax.block_until_ready(focal_tversky_loss(y_pred2, y_true2))
    ref2 = _reference(y_pred2, y_true2)
    assert jnp.allclose(loss2, ref2, rtol=1e-3, atol=1e-6), (loss2, ref2)

    # Same data with a capped tile: exercises multi-step grid, the parallel
    # split axis, clamped idle slots, and the partial last block.
    loss3 = jax.block_until_ready(
        focal_tversky_loss(y_pred2, y_true2, force_pallas=True, _tm_max=512))
    assert jnp.allclose(loss3, ref2, rtol=1e-3, atol=1e-6), (loss3, ref2)

    print("KERNEL_OK")
</pallas_src>

<mosaic_0001>
module attributes {stable_mosaic.version = 11 : i64} {
  func.func @kernel(%arg0: i32, %arg1: i32, %arg2: memref<16x128xf32, #tpu.memory_space<vmem>>, %arg3: memref<16x128xf32, #tpu.memory_space<vmem>>, %arg4: memref<1x3x8x128xf32, #tpu.memory_space<vmem>>) attributes {dimension_semantics = [#tpu.dimension_semantics<parallel>, #tpu.dimension_semantics<arbitrary>], iteration_bounds = array<i64: 1, 1>, scalar_prefetch = 0 : i64, scratch_operands = 0 : i64, tpu.core_type = #tpu.core_type<tc>, window_params = [{transform_indices = @transform_0, window_bounds = array<i64: 16, 128>}, {transform_indices = @transform_1, window_bounds = array<i64: 16, 128>}, {transform_indices = @transform_2, window_bounds = array<i64: 1, 3, 8, 128>}]} {
    %c0_i32 = arith.constant 0 : i32
    %0 = arith.cmpi eq, %arg1, %c0_i32 : i32
    %1 = arith.extui %0 : i1 to i32
    %c0_i32_0 = arith.constant 0 : i32
    %2 = arith.cmpi ne, %1, %c0_i32_0 : i32
    scf.if %2 {
      %cst_28 = arith.constant 0.000000e+00 : f32
      %37 = vector.broadcast %cst_28 : f32 to vector<3x8x128xf32>
      %c0_29 = arith.constant 0 : index
      %c0_30 = arith.constant 0 : index
      %c0_31 = arith.constant 0 : index
      %c0_32 = arith.constant 0 : index
      %38 = vector.load %arg4[%c0_29, %c0_30, %c0_31, %c0_32] : memref<1x3x8x128xf32, #tpu.memory_space<vmem>>, vector<1x3x8x128xf32>
      %39 = vector.shape_cast %38 : vector<1x3x8x128xf32> to vector<3x8x128xf32>
      %40 = vector.shape_cast %37 : vector<3x8x128xf32> to vector<1x3x8x128xf32>
      tpu.vector_store %arg4[%c0_29, %c0_30, %c0_31, %c0_32], %40 {strides = array<i32>} : memref<1x3x8x128xf32, #tpu.memory_space<vmem>>, vector<1x3x8x128xf32>,
    } else {
    }
    %cst = arith.constant 0.000000e+00 : f32
    %3 = vector.broadcast %cst : f32 to vector<8x128xf32>
    %c0_i32_1 = arith.constant 0 : i32
    %c16_i32 = arith.constant 16 : i32
    %4 = arith.muli %c0_i32_1, %c16_i32 : i32
    %5 = tpu.assume_multiple %4, 8 : i32
    %6 = arith.index_cast %5 : i32 to index
    %c0 = arith.constant 0 : index
    %7 = vector.load %arg2[%6, %c0] : memref<16x128xf32, #tpu.memory_space<vmem>>, vector<16x128xf32>
    %8 = arith.index_cast %5 : i32 to index
    %c0_2 = arith.constant 0 : index
    %9 = vector.load %arg3[%8, %c0_2] : memref<16x128xf32, #tpu.memory_space<vmem>>, vector<16x128xf32>
    %10 = vector.shape_cast %7 : vector<16x128xf32> to vector<2x8x128xf32>
    %11 = vector.shape_cast %9 : vector<16x128xf32> to vector<2x8x128xf32>
    %12 = arith.mulf %10, %11 : vector<2x8x128xf32>
    %cst_3 = arith.constant dense<0.000000e+00> : vector<8x128xf32>
    %13 = vector.multi_reduction <add>, %12, %cst_3 [0] : vector<2x8x128xf32> to vector<8x128xf32>
    %14 = arith.addf %3, %13 : vector<8x128xf32>
    %cst_4 = arith.constant dense<0.000000e+00> : vector<8x128xf32>
    %15 = vector.multi_reduction <add>, %10, %cst_4 [0] : vector<2x8x128xf32> to vector<8x128xf32>
    %16 = arith.addf %3, %15 : vector<8x128xf32>
    %cst_5 = arith.constant dense<0.000000e+00> : vector<8x128xf32>
    %17 = vector.multi_reduction <add>, %11, %cst_5 [0] : vector<2x8x128xf32> to vector<8x128xf32>
    %18 = arith.addf %3, %17 : vector<8x128xf32>
    %c1_i32 = arith.constant 1 : i32
    %c0_6 = arith.constant 0 : index
    %c0_7 = arith.constant 0 : index
    %c0_8 = arith.constant 0 : index
    %c0_9 = arith.constant 0 : index
    %19 = vector.load %arg4[%c0_6, %c0_7, %c0_8, %c0_9] : memref<1x3x8x128xf32, #tpu.memory_space<vmem>>, vector<1x1x8x128xf32>
    %20 = vector.shape_cast %19 : vector<1x1x8x128xf32> to vector<8x128xf32>
    %21 = arith.addf %20, %14 : vector<8x128xf32>
    %c0_10 = arith.constant 0 : index
    %c0_11 = arith.constant 0 : index
    %c0_12 = arith.constant 0 : index
    %c0_13 = arith.constant 0 : index
    %22 = vector.load %arg4[%c0_10, %c0_11, %c0_12, %c0_13] : memref<1x3x8x128xf32, #tpu.memory_space<vmem>>, vector<1x1x8x128xf32>
    %23 = vector.shape_cast %22 : vector<1x1x8x128xf32> to vector<8x128xf32>
    %24 = vector.shape_cast %21 : vector<8x128xf32> to vector<1x1x8x128xf32>
    tpu.vector_store %arg4[%c0_10, %c0_11, %c0_12, %c0_13], %24 {strides = array<i32>} : memref<1x3x8x128xf32, #tpu.memory_space<vmem>>, vector<1x1x8x128xf32>,
    %c0_14 = arith.constant 0 : index
    %c1 = arith.constant 1 : index
    %c0_15 = arith.constant 0 : index
    %c0_16 = arith.constant 0 : index
    %25 = vector.load %arg4[%c0_14, %c1, %c0_15, %c0_16] : memref<1x3x8x128xf32, #tpu.memory_space<vmem>>, vector<1x1x8x128xf32>
    %26 = vector.shape_cast %25 : vector<1x1x8x128xf32> to vector<8x128xf32>
    %27 = arith.addf %26, %16 : vector<8x128xf32>
    %c0_17 = arith.constant 0 : index
    %c1_18 = arith.constant 1 : index
    %c0_19 = arith.constant 0 : index
    %c0_20 = arith.constant 0 : index
    %28 = vector.load %arg4[%c0_17, %c1_18, %c0_19, %c0_20] : memref<1x3x8x128xf32, #tpu.memory_space<vmem>>, vector<1x1x8x128xf32>
    %29 = vector.shape_cast %28 : vector<1x1x8x128xf32> to vector<8x128xf32>
    %30 = vector.shape_cast %27 : vector<8x128xf32> to vector<1x1x8x128xf32>
    tpu.vector_store %arg4[%c0_17, %c1_18, %c0_19, %c0_20], %30 {strides = array<i32>} : memref<1x3x8x128xf32, #tpu.memory_space<vmem>>, vector<1x1x8x128xf32>,
    %c0_21 = arith.constant 0 : index
    %c2 = arith.constant 2 : index
    %c0_22 = arith.constant 0 : index
    %c0_23 = arith.constant 0 : index
    %31 = vector.load %arg4[%c0_21, %c2, %c0_22, %c0_23] : memref<1x3x8x128xf32, #tpu.memory_space<vmem>>, vector<1x1x8x128xf32>
    %32 = vector.shape_cast %31 : vector<1x1x8x128xf32> to vector<8x128xf32>
    %33 = arith.addf %32, %18 : vector<8x128xf32>
    %c0_24 = arith.constant 0 : index
    %c2_25 = arith.constant 2 : index
    %c0_26 = arith.constant 0 : index
    %c0_27 = arith.constant 0 : index
    %34 = vector.load %arg4[%c0_24, %c2_25, %c0_26, %c0_27] : memref<1x3x8x128xf32, #tpu.memory_space<vmem>>, vector<1x1x8x128xf32>
    %35 = vector.shape_cast %34 : vector<1x1x8x128xf32> to vector<8x128xf32>
    %36 = vector.shape_cast %33 : vector<8x128xf32> to vector<1x1x8x128xf32>
    tpu.vector_store %arg4[%c0_24, %c2_25, %c0_26, %c0_27], %36 {strides = array<i32>} : memref<1x3x8x128xf32, #tpu.memory_space<vmem>>, vector<1x1x8x128xf32>,
    return
  }
  func.func @transform_0(%arg0: i32, %arg1: i32) -> (i32, i32) {
    %c1_i32 = arith.constant 1 : i32
    %0 = arith.muli %arg0, %c1_i32 : i32
    %1 = arith.addi %0, %arg1 : i32
    %c0_i32 = arith.constant 0 : i32
    %2 = arith.minsi %1, %c0_i32 : i32
    %c0_i32_0 = arith.constant 0 : i32
    %c0_i32_1 = arith.constant 0 : i32
    return %2, %c0_i32_0 : i32, i32
  }
  func.func @transform_1(%arg0: i32, %arg1: i32) -> (i32, i32) {
    %c1_i32 = arith.constant 1 : i32
    %0 = arith.muli %arg0, %c1_i32 : i32
    %1 = arith.addi %0, %arg1 : i32
    %c0_i32 = arith.constant 0 : i32
    %2 = arith.minsi %1, %c0_i32 : i32
    %c0_i32_0 = arith.constant 0 : i32
    %c0_i32_1 = arith.constant 0 : i32
    return %2, %c0_i32_0 : i32, i32
  }
  func.func @transform_2(%arg0: i32, %arg1: i32) -> (i32, i32, i32, i32) {
    %c0_i32 = arith.constant 0 : i32
    %c0_i32_0 = arith.constant 0 : i32
    %c0_i32_1 = arith.constant 0 : i32
    %c0_i32_2 = arith.constant 0 : i32
    return %arg0, %c0_i32, %c0_i32_0, %c0_i32_1 : i32, i32, i32, i32
  }
}

</mosaic_0001>

<bundles_post_ra>
// kernel: tpu_custom_call.1
= control target key start
LH: loop header
LB: loop body
LE: loop exit
PB: predicated region body
PF: predicated region fallthrough
CT: control target
= control target key end

     0   :  { %7 = vsyncpa [#allocation3], 0  ;;  %s222_s0 = inlined_call_operand.hbm [shape: f32[16,128], index: 0, kind: input, shape index: {}]   ;;  %s223_s1 = inlined_call_operand.hbm [shape: f32[16,128], index: 1, kind: input, shape index: {}]   ;;  %s224_s2 = inlined_call_operand.hbm [shape: f32[1,3,8,128], index: 2, kind: output, shape index: {}]  }
   0x1   :  { %8 = vsyncpa [#allocation6], 0 }
   0x2   :  { %9 = vsyncpa [#allocation4], 0  ;;  %s184_s9 = smov [#allocation2]  }
   0x3   :  { %s21_s10 = sshll.u32 %s184_s9, 4  ;;  %s22_s10 = int_to_ptr.vmem [resolvable:$true] %s21_s10 }
   0x4   :  { %s126_s11 = scalar_lea.vmem %s22_s10, 256  ;;  %p131_p1 = scmp.lt.s32.totalorder %s22_s10, %s22_s10 }
   0x5   :  { %p127_p0 = scmp.ne.s32.totalorder %s22_s10, %s126_s11  ;;  %p132_p2 = scmp.lt.s32.totalorder %s126_s11, %s126_s11 }
   0x7   :  { %p133_p3 = por %p132_p2, %p131_p1 }
   0x9   :  { %p134_p4 = pnand %p133_p3, %p127_p0 }
   0xb   :  { %137 = shalt.err (!%p134_p4)
}
   0xc   :  { %s185_s12 = smov 128   ;;  %s186_s13 = smov 8  }
   0xd   :  { %27 = dma.hbm_to_vmem [thread:$0]  %s222_s0, 256, %s22_s10, [#allocation3], %s185_s12, %s185_s12, %s186_s13  }
   0xe   :  { %s187_s16 = smov [#allocation5]  }
   0xf   :  { %s39_s17 = sshll.u32 %s187_s16, 4  ;;  %s40_s17 = int_to_ptr.vmem [resolvable:$true] %s39_s17 }
  0x10   :  { %s146_s18 = scalar_lea.vmem %s40_s17, 256  ;;  %p151_p6 = scmp.lt.s32.totalorder %s40_s17, %s40_s17 }
  0x11   :  { %p147_p5 = scmp.ne.s32.totalorder %s40_s17, %s146_s18  ;;  %p152_p7 = scmp.lt.s32.totalorder %s146_s18, %s146_s18 }
  0x13   :  { %p153_p8 = por %p152_p7, %p151_p6 }
  0x15   :  { %p154_p9 = pnand %p153_p8, %p147_p5 }
  0x17   :  { %157 = shalt.err (!%p154_p9)
}
  0x18   :  { %45 = dma.hbm_to_vmem [thread:$0]  %s223_s1, 256, %s40_s17, [#allocation6], %s185_s12, %s185_s12, %s186_s13  }
  0x19   :  { %178 = dma.done.wait [#allocation3], 256  }
  0x1a   :  { %179 = vsyncadd [#allocation3], 4294967040 }
  0x1b   :  { %180 = dma.done.wait [#allocation6], 256  }
  0x1c   :  { %181 = vsyncadd [#allocation6], 4294967040  ;;  %v67_v0 = vld [vmem:[#allocation2] sm:$0xff]  ;;  %v68_v1 = vld [vmem:[#allocation2 + $0x8] sm:$0xff]  ;;  %s188_s0 = smov [#allocation7]  }
  0x1d   :  { %v69_v2 = vld [vmem:[#allocation5] sm:$0xff]  ;;  %v70_v3 = vld [vmem:[#allocation5 + $0x8] sm:$0xff]  ;;  %v75_v5 = vadd.f32 %v68_v1, %v67_v0  ;;  %s95_s21 = sshll.u32 %s188_s0, 4  ;;  %s96_s21 = int_to_ptr.vmem [resolvable:$true] %s95_s21 }
  0x1e   :  { %v71_v4 = vmul.f32 %v69_v2, %v67_v0  ;;  %v72_v6 = vmul.f32 %v70_v3, %v68_v1  ;;  %v77_v7 = vadd.f32 %v70_v3, %v69_v2  ;;  %s158_s1 = scalar_lea.vmem %s96_s21, 384  ;;  %p163_p11 = scmp.lt.s32.totalorder %s96_s21, %s96_s21 }
  0x1f   :  { %85 = vst [vmem:[#allocation7 + $0x8] sm:$0xff] %v75_v5  ;;  %p159_p10 = scmp.ne.s32.totalorder %s96_s21, %s158_s1  ;;  %p164_p12 = scmp.lt.s32.totalorder %s158_s1, %s158_s1 }
  0x20   :  { %v73_v8 = vadd.f32 %v72_v6, %v71_v4  ;;  %89 = vst [vmem:[#allocation7 + $0x10] sm:$0xff] %v77_v7 }
  0x21   :  { %p165_p13 = por %p164_p12, %p163_p11 }
  0x22   :  { %81 = vst [vmem:[#allocation7] sm:$0xff] %v73_v8 }
  0x23   :  { %p166_p0 = pnand %p165_p13, %p159_p10 }
  0x25   :  { %169 = shalt.err (!%p166_p0)
}
  0x26   :  { %101 = dma.vmem_to_hbm [thread:$0]  %s96_s21, 384, %s224_s2, [#allocation4], %s185_s12, %s185_s12, %s186_s13  }
  0x27   :  { %182 = dma.done.wait [#allocation4], 384  }
  0x28   :  { %183 = vsyncadd [#allocation4], 4294966912 }
  0x29   :  { %105 = vsyncpa [#allocation3], 1 }
  0x2a   :  { %106 = vsyncpa [#allocation6], 1 }
  0x2b   :  { %107 = vsyncpa [#allocation4], 1 }

</bundles_post_ra>
